<compile_context>
chip_gen: v7x
topology: tpu7x:2x2x1
jax: 0.10.0
libtpu: 0.0.40
codegen_flags: <defaults>
</compile_context>

<pallas_src>
import math
import functools

import jax
import jax.numpy as jnp
from jax import lax
from jax.experimental import pallas as pl
from jax.experimental.pallas import tpu as pltpu


def _round_up(x, m):
    return ((x + m - 1) // m) * m


# ---------------------------------------------------------------------------
# Pallas kernel: fused LayerNorm(4C) + (x_norm @ W^T) for one M-tile
# ---------------------------------------------------------------------------
def _norm_reduce_kernel(x_ref, g_ref, b_ref, w_ref, o_ref, *, eps):
    # x_ref: (tm, K) compute dtype (bf16); normalize in f32 for accuracy.
    x = x_ref[...].astype(jnp.float32)
    mean = jnp.mean(x, axis=-1, keepdims=True)
    xc = x - mean
    var = jnp.mean(xc * xc, axis=-1, keepdims=True)
    xn = xc * lax.rsqrt(var + eps)
    y = xn * g_ref[...] + b_ref[...]                       # (tm, K) f32, gamma/beta (1, K)
    acc = jnp.dot(y.astype(w_ref.dtype), w_ref[...],       # MXU, f32 accumulate
                  preferred_element_type=jnp.float32)
    o_ref[...] = acc.astype(o_ref.dtype)


def _fused_norm_linear(a, gamma, beta, w_mat, *, eps, out_dtype, tm=512):
    """a: (M, K) compute-dtype, gamma/beta: (K,) f32, w_mat: (K, Npad) compute-dtype.
    Returns (Mpad, Npad) in out_dtype; caller slices back to (M, N)."""
    M, K = a.shape
    Npad = w_mat.shape[1]

    # Tile M: default 512, clamped for tiny problems; pad M up to a tile multiple.
    tm_eff = min(tm, _round_up(M, 8))
    Mpad = _round_up(M, tm_eff)
    if Mpad != M:
        a = jnp.pad(a, ((0, Mpad - M), (0, 0)))

    itm = jnp.dtype(a.dtype).itemsize
    ito = jnp.dtype(out_dtype).itemsize
    # double-buffered tiles: A tile + resident weight + output tile + gamma/beta rows
    vmem_bytes = 2 * (tm_eff * K * itm + K * Npad * itm + tm_eff * Npad * ito + 2 * K * 4)
    vmem_limit = int(min(max(vmem_bytes * 3 // 2 + (4 << 20), 16 << 20), 64 << 20))

    kernel = functools.partial(_norm_reduce_kernel, eps=eps)
    out = pl.pallas_call(
        kernel,
        out_shape=jax.ShapeDtypeStruct((Mpad, Npad), out_dtype),
        grid=(Mpad // tm_eff,),
        in_specs=[
            pl.BlockSpec((tm_eff, K), lambda i: (i, 0)),   # activation row-tile
            pl.BlockSpec((1, K), lambda i: (0, 0)),        # gamma (resident)
            pl.BlockSpec((1, K), lambda i: (0, 0)),        # beta  (resident)
            pl.BlockSpec((K, Npad), lambda i: (0, 0)),     # weight (resident)
        ],
        out_specs=pl.BlockSpec((tm_eff, Npad), lambda i: (i, 0)),
        compiler_params=pltpu.CompilerParams(
            dimension_semantics=("parallel",),
            vmem_limit_bytes=vmem_limit,
        ),
    )(a, gamma.reshape(1, K), beta.reshape(1, K), w_mat)
    return out


# ---------------------------------------------------------------------------
# JAX glue: 2x2 even/odd space-to-depth (pure layout, no heavy compute)
# ---------------------------------------------------------------------------
def _patch_merge_rearrange(x, H, W):
    """(B, H*W, C) -> (B, ceil(H/2)*ceil(W/2), 4C), matching torch.cat([x0,x1,x2,x3], -1)."""
    B, L, C = x.shape
    x = x.reshape(B, H, W, C)
    Hp, Wp = H + (H % 2), W + (W % 2)
    if Hp != H or Wp != W:
        x = jnp.pad(x, ((0, 0), (0, Hp - H), (0, Wp - W), (0, 0)))
    # (B, h, row_parity, w, col_parity, C) -> (B, h, w, col_parity, row_parity, C)
    x = x.reshape(B, Hp // 2, 2, Wp // 2, 2, C)
    x = jnp.transpose(x, (0, 1, 3, 4, 2, 5))
    return x.reshape(B, (Hp // 2) * (Wp // 2), 4 * C)


def patch_merging_forward(x, H, W, gamma, beta, weight, *, eps=1e-5,
                          compute_dtype=jnp.bfloat16, tm=512):
    """Equivalent of PatchMerging.forward.

    x:      (B, H*W, C)
    gamma:  (4C,)  LayerNorm weight
    beta:   (4C,)  LayerNorm bias
    weight: (2C, 4C)  nn.Linear(4C, 2C, bias=False).weight
    Returns (B, ceil(H/2)*ceil(W/2), 2C) in x.dtype.
    """
    B, L, C = x.shape
    assert L == H * W, "input feature has wrong size"
    K, N = 4 * C, 2 * C

    xm = _patch_merge_rearrange(x, H, W)            # (B, L', 4C)
    Lp = xm.shape[1]
    a = xm.reshape(B * Lp, K).astype(compute_dtype)

    # Lane-dense output: pad N (=2C) up to a multiple of 128, slice after.
    Npad = max(128, _round_up(N, 128))
    w_mat = weight.reshape(N, K).T                  # (K, N)
    if Npad != N:
        w_mat = jnp.pad(w_mat, ((0, 0), (0, Npad - N)))
    w_mat = w_mat.astype(compute_dtype)

    out = _fused_norm_linear(a, gamma.astype(jnp.float32), beta.astype(jnp.float32),
                             w_mat, eps=eps, out_dtype=x.dtype, tm=tm)
    return out[: B * Lp, :N].reshape(B, Lp, N)


# ---------------------------------------------------------------------------
# Pure-JAX reference (mirrors the PyTorch forward, f32)
# ---------------------------------------------------------------------------
def _reference(x, H, W, gamma, beta, weight, eps=1e-5):
    B, L, C = x.shape
    xr = x.reshape(B, H, W, C)
    if H % 2 == 1 or W % 2 == 1:
        xr = jnp.pad(xr, ((0, 0), (0, H % 2), (0, W % 2), (0, 0)))
    x0 = xr[:, 0::2, 0::2, :]
    x1 = xr[:, 1::2, 0::2, :]
    x2 = xr[:, 0::2, 1::2, :]
    x3 = xr[:, 1::2, 1::2, :]
    xc = jnp.concatenate([x0, x1, x2, x3], axis=-1).reshape(B, -1, 4 * C)
    mu = jnp.mean(xc, axis=-1, keepdims=True)
    var = jnp.mean((xc - mu) ** 2, axis=-1, keepdims=True)
    xn = (xc - mu) / jnp.sqrt(var + eps) * gamma + beta
    return xn @ weight.T


# ---------------------------------------------------------------------------
# Demo / self-check
# ---------------------------------------------------------------------------
if __name__ == "__main__":
    B, dim, H, W = 2, 32, 8, 8                      # x: (2, 64, 32)
    key = jax.random.PRNGKey(0)
    kx, kw_, kg, kb = jax.random.split(key, 4)

    x = jax.random.normal(kx, (B, H * W, dim), dtype=jnp.float32)

    bound = 1.0 / math.sqrt(4 * dim)
    weight = jax.random.uniform(kw_, (2 * dim, 4 * dim),
                                minval=-bound, maxval=bound, dtype=jnp.float32)
    gamma = 1.0 + 0.1 * jax.random.normal(kg, (4 * dim,), dtype=jnp.float32)
    beta = 0.1 * jax.random.normal(kb, (4 * dim,), dtype=jnp.float32)

    out = patch_merging_forward(x, H, W, gamma, beta, weight)
    out = jax.block_until_ready(out)
    ref = _reference(x, H, W, gamma, beta, weight)

    assert out.shape == (B, (H // 2) * (W // 2), 2 * dim), out.shape
    # bf16 inputs / f32 accumulation -> relaxed tolerance vs f32 reference
    assert jnp.allclose(out, ref, atol=5e-2, rtol=5e-2), "mismatch vs reference (even H/W)"

    # Odd-resolution path (exercises the pad branch): H = W = 7
    Ho = Wo = 7
    xo = jax.random.normal(kx, (B, Ho * Wo, dim), dtype=jnp.float32)
    out_o = jax.block_until_ready(patch_merging_forward(xo, Ho, Wo, gamma, beta, weight))
    ref_o = _reference(xo, Ho, Wo, gamma, beta, weight)
    assert out_o.shape == (B, ((Ho + 1) // 2) * ((Wo + 1) // 2), 2 * dim), out_o.shape
    assert jnp.allclose(out_o, ref_o, atol=5e-2, rtol=5e-2), "mismatch vs reference (odd H/W)"

    print("KERNEL_OK")
</pallas_src>

<mosaic_0001>
module attributes {stable_mosaic.version = 11 : i64} {
  func.func @_norm_reduce_kernel(%arg0: i32, %arg1: memref<32x128xbf16, #tpu.memory_space<vmem>>, %arg2: memref<1x128xf32, #tpu.memory_space<vmem>>, %arg3: memref<1x128xf32, #tpu.memory_space<vmem>>, %arg4: memref<128x128xbf16, #tpu.memory_space<vmem>>, %arg5: memref<32x128xf32, #tpu.memory_space<vmem>>) attributes {dimension_semantics = [#tpu.dimension_semantics<parallel>], iteration_bounds = array<i64: 1>, scalar_prefetch = 0 : i64, scratch_operands = 0 : i64, tpu.core_type = #tpu.core_type<tc>, window_params = [{transform_indices = @transform_0, window_bounds = array<i64: 32, 128>}, {pipeline_mode = #tpu.pipeline_mode<synchronous>, transform_indices = @transform_1, window_bounds = array<i64: 1, 128>}, {pipeline_mode = #tpu.pipeline_mode<synchronous>, transform_indices = @transform_2, window_bounds = array<i64: 1, 128>}, {pipeline_mode = #tpu.pipeline_mode<synchronous>, transform_indices = @transform_3, window_bounds = array<i64: 128, 128>}, {transform_indices = @transform_4, window_bounds = array<i64: 32, 128>}]} {
    %c0 = arith.constant 0 : index
    %c0_0 = arith.constant 0 : index
    %0 = vector.load %arg1[%c0, %c0_0] : memref<32x128xbf16, #tpu.memory_space<vmem>>, vector<32x128xbf16>
    %1 = arith.extf %0 : vector<32x128xbf16> to vector<32x128xf32>
    %cst = arith.constant dense<0.000000e+00> : vector<32xf32>
    %2 = vector.multi_reduction <add>, %1, %cst [1] : vector<32x128xf32> to vector<32xf32>
    %3 = vector.shape_cast %2 : vector<32xf32> to vector<32x1xf32>
    %cst_1 = arith.constant 1.280000e+02 : f32
    %4 = vector.broadcast %cst_1 : f32 to vector<32x1xf32>
    %5 = arith.divf %3, %4 : vector<32x1xf32>
    %6 = vector.broadcast %5 : vector<32x1xf32> to vector<32x128xf32>
    %7 = arith.subf %1, %6 : vector<32x128xf32>
    %8 = arith.mulf %7, %7 : vector<32x128xf32>
    %cst_2 = arith.constant dense<0.000000e+00> : vector<32xf32>
    %9 = vector.multi_reduction <add>, %8, %cst_2 [1] : vector<32x128xf32> to vector<32xf32>
    %10 = vector.shape_cast %9 : vector<32xf32> to vector<32x1xf32>
    %cst_3 = arith.constant 1.280000e+02 : f32
    %11 = vector.broadcast %cst_3 : f32 to vector<32x1xf32>
    %12 = arith.divf %10, %11 : vector<32x1xf32>
    %cst_4 = arith.constant 9.99999974E-6 : f32
    %13 = vector.broadcast %cst_4 : f32 to vector<32x1xf32>
    %14 = arith.addf %12, %13 : vector<32x1xf32>
    %15 = math.rsqrt %14 : vector<32x1xf32>
    %16 = vector.broadcast %15 : vector<32x1xf32> to vector<32x128xf32>
    %17 = arith.mulf %7, %16 : vector<32x128xf32>
    %c0_5 = arith.constant 0 : index
    %c0_6 = arith.constant 0 : index
    %18 = vector.load %arg2[%c0_5, %c0_6] : memref<1x128xf32, #tpu.memory_space<vmem>>, vector<1x128xf32>
    %19 = vector.broadcast %18 : vector<1x128xf32> to vector<32x128xf32>
    %20 = arith.mulf %17, %19 : vector<32x128xf32>
    %c0_7 = arith.constant 0 : index
    %c0_8 = arith.constant 0 : index
    %21 = vector.load %arg3[%c0_7, %c0_8] : memref<1x128xf32, #tpu.memory_space<vmem>>, vector<1x128xf32>
    %22 = vector.broadcast %21 : vector<1x128xf32> to vector<32x128xf32>
    %23 = arith.addf %20, %22 : vector<32x128xf32>
    %24 = arith.truncf %23 : vector<32x128xf32> to vector<32x128xbf16>
    %c0_9 = arith.constant 0 : index
    %c0_10 = arith.constant 0 : index
    %25 = vector.load %arg4[%c0_9, %c0_10] : memref<128x128xbf16, #tpu.memory_space<vmem>>, vector<128x128xbf16>
    %cst_11 = arith.constant dense<0.000000e+00> : vector<32x128xf32>
    %26 = tpu.matmul %24, %25, %cst_11 {dimension_numbers = #tpu.dot_dimension_numbers<[1], [0], [0], [1], [0, 0, 1, 1], [], []>} : vector<32x128xbf16>, vector<128x128xbf16>, vector<32x128xf32> -> vector<32x128xf32>
    %c0_12 = arith.constant 0 : index
    %c0_13 = arith.constant 0 : index
    %27 = vector.load %arg5[%c0_12, %c0_13] : memref<32x128xf32, #tpu.memory_space<vmem>>, vector<32x128xf32>
    tpu.vector_store %arg5[%c0_12, %c0_13], %26 {strides = array<i32>} : memref<32x128xf32, #tpu.memory_space<vmem>>, vector<32x128xf32>,
    return
  }
  func.func @transform_0(%arg0: i32) -> (i32, i32) {
    %c0_i32 = arith.constant 0 : i32
    %c0_i32_0 = arith.constant 0 : i32
    return %arg0, %c0_i32 : i32, i32
  }
  func.func @transform_1(%arg0: i32) -> (i32, i32) {
    %c0_i32 = arith.constant 0 : i32
    %c0_i32_0 = arith.constant 0 : i32
    %c0_i32_1 = arith.constant 0 : i32
    return %c0_i32, %c0_i32_0 : i32, i32
  }
  func.func @transform_2(%arg0: i32) -> (i32, i32) {
    %c0_i32 = arith.constant 0 : i32
    %c0_i32_0 = arith.constant 0 : i32
    %c0_i32_1 = arith.constant 0 : i32
    return %c0_i32, %c0_i32_0 : i32, i32
  }
  func.func @transform_3(%arg0: i32) -> (i32, i32) {
    %c0_i32 = arith.constant 0 : i32
    %c0_i32_0 = arith.constant 0 : i32
    %c0_i32_1 = arith.constant 0 : i32
    return %c0_i32, %c0_i32_0 : i32, i32
  }
  func.func @transform_4(%arg0: i32) -> (i32, i32) {
    %c0_i32 = arith.constant 0 : i32
    %c0_i32_0 = arith.constant 0 : i32
    return %arg0, %c0_i32 : i32, i32
  }
}

</mosaic_0001>

<bundles_post_ra>
// kernel: tpu_custom_call.1
= control target key start
LH: loop header
LB: loop body
LE: loop exit
PB: predicated region body
PF: predicated region fallthrough
CT: control target
= control target key end

     0   :  { %9 = vsyncpa [#allocation3], 0  ;;  %s477_s0 = inlined_call_operand.hbm [shape: bf16[32,128], index: 0, kind: input, shape index: {}]   ;;  %s478_s1 = inlined_call_operand.vmem [shape: f32[1,128], index: 1, kind: input, shape index: {}]   ;;  %s479_s2 = inlined_call_operand.vmem [shape: f32[1,128], index: 2, kind: input, shape index: {}]   ;;  %s480_s3 = inlined_call_operand.hbm [shape: bf16[128,128], index: 3, kind: input, shape index: {}]   ;;  %s481_s4 = inlined_call_operand.hbm [shape: f32[32,128], index: 4, kind: output, shape index: {}]  }
   0x1   :  { %10 = vsyncpa [#allocation6], 0 }
   0x2   :  { %11 = vsyncpa [#allocation4], 0  ;;  %s403_s15 = smov [#allocation2]   ;;  %s331_s19 = scalar_lea.hbm %s477_s0, 256 }
   0x3   :  { %s17_s16 = sshll.u32 %s403_s15, 4  ;;  %p332_p0 = scmp.ne.s32.totalorder %s477_s0, %s331_s19  ;;  %s18_s16 = int_to_ptr.vmem [resolvable:$true] %s17_s16 }
   0x4   :  { %p335_p1 = scmp.lt.u32.totalorder %s331_s19, %s477_s0 }
   0x6   :  { %p337_p2 = pnand %p335_p1, %p332_p0 }
   0x8   :  { %340 = shalt.err (!%p337_p2)
}
   0x9   :  { %s341_s24 = scalar_lea.vmem %s18_s16, 256  ;;  %p346_p4 = scmp.lt.s32.totalorder %s18_s16, %s18_s16 }
   0xa   :  { %p342_p3 = scmp.ne.s32.totalorder %s18_s16, %s341_s24  ;;  %p347_p5 = scmp.lt.s32.totalorder %s341_s24, %s341_s24 }
   0xc   :  { %p348_p6 = por %p347_p5, %p346_p4 }
   0xe   :  { %p349_p7 = pnand %p348_p6, %p342_p3 }
  0x10   :  { %352 = shalt.err (!%p349_p7)
}
  0x11   :  { %s404_s25 = smov 64   ;;  %s405_s26 = smov 4  }
  0x12   :  { %23 = dma.hbm_to_vmem [thread:$0]  %s477_s0, 256, %s18_s16, [#allocation3], %s404_s25, %s404_s25, %s405_s26  }
  0x13   :  { %s406_s29 = smov [#allocation5]   ;;  %s353_s7 = scalar_lea.hbm %s480_s3, 1024 }
  0x14   :  { %s33_s30 = sshll.u32 %s406_s29, 4  ;;  %p354_p8 = scmp.ne.s32.totalorder %s480_s3, %s353_s7  ;;  %s34_s30 = int_to_ptr.vmem [resolvable:$true] %s33_s30 }
  0x15   :  { %p357_p9 = scmp.lt.u32.totalorder %s353_s7, %s480_s3 }
  0x17   :  { %p359_p10 = pnand %p357_p9, %p354_p8 }
  0x19   :  { %362 = shalt.err (!%p359_p10)
}
  0x1a   :  { %s363_s12 = scalar_lea.vmem %s34_s30, 1024  ;;  %p368_p12 = scmp.lt.s32.totalorder %s34_s30, %s34_s30 }
  0x1b   :  { %p364_p11 = scmp.ne.s32.totalorder %s34_s30, %s363_s12  ;;  %p369_p13 = scmp.lt.s32.totalorder %s363_s12, %s363_s12 }
  0x1d   :  { %p370_p0 = por %p369_p13, %p368_p12 }
  0x1f   :  { %p371_p1 = pnand %p370_p0, %p364_p11 }
  0x21   :  { %374 = shalt.err (!%p371_p1)
}
  0x22   :  { %39 = dma.hbm_to_vmem [thread:$0]  %s480_s3, 1024, %s34_s30, [#allocation6], %s404_s25, %s404_s25, %s405_s26  }
  0x23   :  { %397 = dma.done.wait [#allocation3], 256  }
  0x24   :  { %398 = vsyncadd [#allocation3], 4294967040 }
  0x25   :  { %399 = dma.done.wait [#allocation6], 1024  }
  0x26   :  { %400 = vsyncadd [#allocation6], 4294966272  ;;  %v270_v0 = vld [vmem:[#allocation2] sm:$0xff]   ;;  %v277_v1 = vld [vmem:[#allocation2 + $0x8] sm:$0xff]  }
  0x27   :  { %v271_v2 = vunpack.c.l.bf16 %v270_v0  ;;  %v275_v3 = vunpack.c.l.bf16 %v277_v1  ;;  %v272_v4 = vunpack.c.h.bf16 %v270_v0  ;;  %v276_v5 = vunpack.c.h.bf16 %v277_v1  ;;  %v315_v6 = vld [vmem:[#allocation5] sm:$0xff]   ;;  %v316_v23 = vld [vmem:[#allocation5 + $0x8] sm:$0xff]   ;;  %v317_v24 = vld [vmem:[#allocation5 + $0x10] sm:$0xff]  }
  0x28   :  { %288 = vmatprep.subr.bf16.mxu0 %v315_v6  ;;  %v318_v25 = vld [vmem:[#allocation5 + $0x18] sm:$0xff]   ;;  %v319_v26 = vld [vmem:[#allocation5 + $0x20] sm:$0xff]   ;;  %v320_v27 = vld [vmem:[#allocation5 + $0x28] sm:$0xff]  }
  0x29   :  { %55 = vadd.xlane.f32.xlu0 %v271_v2  ;;  %59 = vadd.xlane.f32.xlu1 %v275_v3  ;;  %v321_v28 = vld [vmem:[#allocation5 + $0x30] sm:$0xff]   ;;  %v322_v29 = vld [vmem:[#allocation5 + $0x38] sm:$0xff]  }
  0x2a   :  { %289 = vmatpush3.bf16.msra.mxu0 %v315_v6  ;;  %v259_v44 = vld [vmem:[%s478_s1] ss:$0 sm:$0xff]  ;;  %s407_s1 = smov [#allocation7]  }
  0x2b   :  { %290 = vmatprep.subr.bf16.mxu0 %v316_v23  ;;  %v260_v49 = vld [vmem:[%s479_s2] ss:$0 sm:$0xff]  ;;  %s246_s17 = sshll.u32 %s407_s1, 4  ;;  %s247_s17 = int_to_ptr.vmem [resolvable:$true] %s246_s17 }
  0x2c   :  { %s375_s2 = scalar_lea.vmem %s247_s17, 512  ;;  %p380_p3 = scmp.lt.s32.totalorder %s247_s17, %s247_s17 }
  0x2d   :  { %57 = vadd.xlane.f32.xlu0 %v272_v4  ;;  %61 = vadd.xlane.f32.xlu1 %v276_v5  ;;  %p376_p2 = scmp.ne.s32.totalorder %s247_s17, %s375_s2  ;;  %p381_p4 = scmp.lt.s32.totalorder %s375_s2, %s375_s2 }
  0x2e   :  { %291 = vmatpush3.bf16.msra.mxu0 %v316_v23 }
  0x2f   :  { %292 = vmatprep.subr.bf16.mxu0 %v317_v24  ;;  %p382_p5 = por %p381_p4, %p380_p3 }
  0x31   :  { %p383_p6 = pnand %p382_p5, %p376_p2 }
  0x32   :  { %293 = vmatpush3.bf16.msra.mxu0 %v317_v24 }
  0x33   :  { %294 = vmatprep.subr.bf16.mxu0 %v318_v25 }
  0x36   :  { %295 = vmatpush3.bf16.msra.mxu0 %v318_v25 }
  0x37   :  { %296 = vmatprep.subr.bf16.mxu0 %v319_v26 }
  0x3a   :  { %297 = vmatpush3.bf16.msra.mxu0 %v319_v26 }
  0x3b   :  { %298 = vmatprep.subr.bf16.mxu0 %v320_v27 }
  0x3e   :  { %299 = vmatpush3.bf16.msra.mxu0 %v320_v27 }
  0x3f   :  { %300 = vmatprep.subr.bf16.mxu0 %v321_v28 }
  0x42   :  { %301 = vmatpush3.bf16.msra.mxu0 %v321_v28 }
  0x43   :  { %302 = vmatprep.subr.bf16.mxu0 %v322_v29 }
  0x46   :  { %303 = vmatpush3.bf16.msra.mxu0 %v322_v29 }
  0xb6   :  { %v56_v7 = vpop.xlane.xlu0 %55  ;;  %v60_v8 = vpop.xlane.xlu1 %59 }
  0xb7   :  { %v64_v9 = vmul.f32 0.0078125, %v56_v7  ;;  %v66_v10 = vmul.f32 0.0078125, %v60_v8 }
  0xb9   :  { %v68_v11 = vsub.f32 %v271_v2, %v64_v9  ;;  %v70_v12 = vsub.f32 %v275_v3, %v66_v10 }
  0xba   :  { %v58_v13 = vpop.xlane.xlu0 %57  ;;  %v62_v14 = vpop.xlane.xlu1 %61 }
  0xbb   :  { %v65_v15 = vmul.f32 0.0078125, %v58_v13  ;;  %v72_v16 = vmul.f32 %v68_v11, %v68_v11  ;;  %v67_v17 = vmul.f32 0.0078125, %v62_v14  ;;  %v74_v20 = vmul.f32 %v70_v12, %v70_v12 }
  0xbd   :  { %v69_v18 = vsub.f32 %v272_v4, %v65_v15  ;;  %76 = vadd.xlane.f32.xlu0 %v72_v16  ;;  %v71_v19 = vsub.f32 %v276_v5, %v67_v17 }
  0xbf   :  { %v73_v21 = vmul.f32 %v69_v18, %v69_v18  ;;  %v75_v22 = vmul.f32 %v71_v19, %v71_v19 }
  0xc1   :  { %80 = vadd.xlane.f32.xlu0 %v74_v20  ;;  %78 = vadd.xlane.f32.xlu1 %v73_v21 }
  0xc5   :  { %82 = vadd.xlane.f32.xlu1 %v75_v22 }
 0x14a   :  { %v77_v30 = vpop.xlane.xlu0 %76 }
 0x14b   :  { %v84_v31 = vmul.f32 0.0078125, %v77_v30 }
 0x14d   :  { %v88_v32 = vadd.f32 1e-05, %v84_v31 }
 0x14e   :  { %v79_v33 = vpop.xlane.xlu1 %78  ;;  %v81_v34 = vpop.xlane.xlu0 %80 }
 0x14f   :  { %323 = vrsqrt.f32 %v88_v32  ;;  %v85_v35 = vmul.f32 0.0078125, %v79_v33  ;;  %v86_v36 = vmul.f32 0.0078125, %v81_v34 }
 0x151   :  { %v89_v37 = vadd.f32 1e-05, %v85_v35  ;;  %v90_v38 = vadd.f32 1e-05, %v86_v36 }
 0x152   :  { %v83_v39 = vpop.xlane.xlu1 %82 }
 0x153   :  { %325 = vrsqrt.f32 %v89_v37  ;;  %v87_v40 = vmul.f32 0.0078125, %v83_v39 }
 0x154   :  { %327 = vrsqrt.f32 %v90_v38 }
 0x155   :  { %v91_v41 = vadd.f32 1e-05, %v87_v40 }
 0x157   :  { %329 = vrsqrt.f32 %v91_v41 }
 0x159   :  { %v324_v42 = vpop.eup %323 }
 0x15a   :  { %v96_v43 = vmul.f32 %v324_v42, %v68_v11 }
 0x15c   :  { %v107_v48 = vmul.f32 %v259_v44, %v96_v43 }
 0x15d   :  { %v326_v45 = vpop.eup %325 }
 0x15e   :  { %v328_v46 = vpop.eup %327  ;;  %v97_v47 = vmul.f32 %v326_v45, %v69_v18  ;;  %v118_v53 = vadd.f32 %v260_v49, %v107_v48 }
 0x15f   :  { %v98_v50 = vmul.f32 %v328_v46, %v70_v12 }
 0x160   :  { %v108_v51 = vmul.f32 %v259_v44, %v97_v47 }
 0x161   :  { %v330_v52 = vpop.eup %329  ;;  %v109_v56 = vmul.f32 %v259_v44, %v98_v50 }
 0x162   :  { %v119_v54 = vadd.f32 %v260_v49, %v108_v51  ;;  %v99_v55 = vmul.f32 %v330_v52, %v71_v19 }
 0x163   :  { %v120_v59 = vadd.f32 %v260_v49, %v109_v56 }
 0x164   :  { %v122_v57 = vpack.c.bf16 %v119_v54, %v118_v53  ;;  %v110_v58 = vmul.f32 %v259_v44, %v99_v55 }
 0x166   :  { %304 = vmatprep.mubr.bf16.mxu0 %v122_v57  ;;  %v121_v60 = vadd.f32 %v260_v49, %v110_v58 }
 0x168   :  { %v123_v61 = vpack.c.bf16 %v121_v60, %v120_v59 }
 0x16a   :  { %305 = vmatmul.mubr.bf16.vlgmr.msra.gmra.mrb[0].mxu0 %v123_v61 }
 0x23d   :  { %v306_v62 = vpop.f32.mrb[0].mxu0 }
 0x23e   :  { %239 = vst [vmem:[#allocation7 + $0x10] sm:$0xff] %v306_v62  ;;  %v222_v63 = vpop.f32.mrb[1].mxu0 }
 0x23f   :  { %237 = vst [vmem:[#allocation7] sm:$0xff] %v222_v63  ;;  %v307_v0 = vpop.f32.mrb[2].mxu0 }
 0x240   :  { %240 = vst [vmem:[#allocation7 + $0x18] sm:$0xff] %v307_v0  ;;  %v225_v1 = vpop.f32.mrb[3].mxu0 }
 0x241   :  { %238 = vst [vmem:[#allocation7 + $0x8] sm:$0xff] %v225_v1 }
 0x242   :  { %386 = shalt.err (!%p383_p6)
}
 0x243   :  { %s387_s20 = scalar_lea.hbm %s481_s4, 512 }
 0x244   :  { %p388_p7 = scmp.ne.s32.totalorder %s481_s4, %s387_s20  ;;  %p391_p8 = scmp.lt.u32.totalorder %s387_s20, %s481_s4 }
 0x246   :  { %p393_p9 = pnand %p391_p8, %p388_p7 }
 0x248   :  { %396 = shalt.err (!%p393_p9)
}
 0x249   :  { %s408_s25 = smov 128   ;;  %s409_s26 = smov 8  }
 0x24a   :  { %252 = dma.vmem_to_hbm [thread:$0]  %s247_s17, 512, %s481_s4, [#allocation4], %s408_s25, %s408_s25, %s409_s26  }
 0x24b   :  { %401 = dma.done.wait [#allocation4], 512  }
 0x24c   :  { %402 = vsyncadd [#allocation4], 4294966784 }
 0x24d   :  { %256 = vsyncpa [#allocation3], 1 }
 0x24e   :  { %257 = vsyncpa [#allocation6], 1 }
 0x24f   :  { %258 = vsyncpa [#allocation4], 1 }

</bundles_post_ra>
